<compile_context>
chip_gen: v5e
topology: v5e:2x2
jax: 0.10.0
libtpu: 0.0.40
codegen_flags: <defaults>
</compile_context>

<pallas_src>
import functools

import jax
import jax.numpy as jnp
from jax.experimental import pallas as pl
from jax.experimental.pallas import tpu as pltpu


def _round_up(v, m):
    return ((v + m - 1) // m) * m


def _mlp_kernel(xin_ref, w1p_ref, b1_ref, w2p_ref, b2_ref, w3p_ref, b3_ref,
                o_ref, *, n_hidden_repeats, use_bf16_matmul):
    """Packed MLP tile.

    xin_ref : (cm, 2p)   interleaved [x_0, y_0, ..., x_{p-1}, y_{p-1}]
    w1p_ref : (2p, Hp)   block-diagonal W1.T
    b1_ref  : (1, Hp)    lane-tiled b1
    w2p_ref : (Hp, Hp)   block-diagonal W2.T
    b2_ref  : (1, Hp)    lane-tiled b2
    w3p_ref : (Hp, Op)   block-diagonal W3.T
    b3_ref  : (1, Op)    lane-tiled b3
    o_ref   : (cm, Op)   packed output
    """
    dot_dtype = jnp.bfloat16 if use_bf16_matmul else jnp.float32

    # Layer 1: one small MXU matmul on the packed input -> lane-dense (cm, Hp).
    h = jnp.tanh(
        jnp.dot(xin_ref[...], w1p_ref[...], preferred_element_type=jnp.float32)
        + b1_ref[...])

    # 5 hidden layers sharing W_2 / b_2 (block-diagonal => per-chunk matmul).
    # Biases stay (1, Hp); the add broadcasts per-vreg (no (cm, Hp) constants).
    w2 = w2p_ref[...].astype(dot_dtype)
    b2 = b2_ref[...]
    for _ in range(n_hidden_repeats):
        h = jnp.tanh(
            jnp.dot(h.astype(dot_dtype), w2, preferred_element_type=jnp.float32)
            + b2)

    # Output layer: packed (cm, p*O) store, no 128-lane padding.
    o_ref[...] = (
        jnp.dot(h.astype(dot_dtype), w3p_ref[...].astype(dot_dtype),
                preferred_element_type=jnp.float32)
        + b3_ref[...]
    ).astype(o_ref.dtype)


def net_forward(x, y, params, *, tile_m=None, use_bf16_matmul=False):
    """Pallas forward pass. x, y: (N,) float32. Returns (N, num_output)."""
    w1, b1, w2, b2, w3, b3 = params
    n = x.shape[0]
    num_hidden = w1.shape[0]
    num_output = w3.shape[0]
    n_hidden_repeats = 5

    # Lane-packing factor: how many independent row chunks fit in 128 lanes.
    if num_hidden < 128 and 128 % num_hidden == 0:
        n_pack = 128 // num_hidden
    else:
        n_pack = 1
    hp = n_pack * num_hidden          # packed hidden width (128 for H=32)
    op = n_pack * num_output          # packed output width
    kp = n_pack * 2                   # packed input width

    # --- Tile / grid selection ------------------------------------------------
    # cm = packed rows per grid step; tile_m (if given) = original rows / step.
    if tile_m is None:
        cm = min(512, max(8, _round_up(pl.cdiv(n, 2 * n_pack), 8)))
    else:
        cm = max(8, _round_up(int(tile_m) // n_pack, 8))
    g = pl.cdiv(n, n_pack * cm)
    if g % 2:
        g += 1                        # even grid: v7x megacore splits evenly
    n_pad = g * n_pack * cm

    # --- Pack inputs ----------------------------------------------------------
    xf = x.astype(jnp.float32)
    yf = y.astype(jnp.float32)
    if n_pad != n:
        xf = jnp.pad(xf, (0, n_pad - n))
        yf = jnp.pad(yf, (0, n_pad - n))
    xy = jnp.stack((xf, yf), axis=-1)                       # (n_pad, 2)
    # xin[t*cm + i, 2c + f] = xy[t*(p*cm) + c*cm + i, f]
    xin = (xy.reshape(g, n_pack, cm, 2)
             .transpose(0, 2, 1, 3)
             .reshape(g * cm, kp))

    # --- Pack weights (block-diagonal) & biases (lane-tiled) ------------------
    w1t = w1.T.astype(jnp.float32)                          # (2, H)
    w2t = w2.T.astype(jnp.float32)                          # (H, H)
    w3t = w3.T.astype(jnp.float32)                          # (H, O)
    w1p = jnp.zeros((kp, hp), jnp.float32)
    w2p = jnp.zeros((hp, hp), jnp.float32)
    w3p = jnp.zeros((hp, op), jnp.float32)
    for c in range(n_pack):
        w1p = w1p.at[2 * c:2 * c + 2,
                     c * num_hidden:(c + 1) * num_hidden].set(w1t)
        w2p = w2p.at[c * num_hidden:(c + 1) * num_hidden,
                     c * num_hidden:(c + 1) * num_hidden].set(w2t)
        w3p = w3p.at[c * num_hidden:(c + 1) * num_hidden,
                     c * num_output:(c + 1) * num_output].set(w3t)
    b1p = jnp.tile(b1.astype(jnp.float32).reshape(1, num_hidden), (1, n_pack))
    b2p = jnp.tile(b2.astype(jnp.float32).reshape(1, num_hidden), (1, n_pack))
    b3p = jnp.tile(b3.astype(jnp.float32).reshape(1, num_output), (1, n_pack))

    # --- Cost estimate (advisory) --------------------------------------------
    packed_rows = g * cm
    flops = 2 * packed_rows * (kp * hp
                               + n_hidden_repeats * hp * hp
                               + hp * op)
    transcendentals = (n_hidden_repeats + 1) * packed_rows * hp
    bytes_accessed = 4 * (packed_rows * (kp + op)
                          + kp * hp + hp
                          + hp * hp + hp
                          + hp * op + op)

    kernel = functools.partial(_mlp_kernel,
                               n_hidden_repeats=n_hidden_repeats,
                               use_bf16_matmul=use_bf16_matmul)

    out_packed = pl.pallas_call(
        kernel,
        out_shape=jax.ShapeDtypeStruct((g * cm, op), jnp.float32),
        grid_spec=pltpu.PrefetchScalarGridSpec(
            num_scalar_prefetch=0,
            grid=(g,),
            in_specs=[
                pl.BlockSpec((cm, kp), lambda i: (i, 0)),    # packed (x, y)
                pl.BlockSpec((kp, hp), lambda i: (0, 0)),    # W1.T block-diag
                pl.BlockSpec((1, hp), lambda i: (0, 0)),     # b1 tiled
                pl.BlockSpec((hp, hp), lambda i: (0, 0)),    # W2.T block-diag
                pl.BlockSpec((1, hp), lambda i: (0, 0)),     # b2 tiled
                pl.BlockSpec((hp, op), lambda i: (0, 0)),    # W3.T block-diag
                pl.BlockSpec((1, op), lambda i: (0, 0)),     # b3 tiled
            ],
            out_specs=pl.BlockSpec((cm, op), lambda i: (i, 0)),
        ),
        compiler_params=pltpu.CompilerParams(
            dimension_semantics=("parallel",)),
        cost_estimate=pl.CostEstimate(flops=int(flops),
                                      transcendentals=int(transcendentals),
                                      bytes_accessed=int(bytes_accessed)),
    )(xin, w1p, b1p, w2p, b2p, w3p, b3p)

    # Un-pack: out[t*(p*cm) + c*cm + i, :] = out_packed[t*cm + i, c*O:(c+1)*O]
    out = (out_packed.reshape(g, cm, n_pack, num_output)
                     .transpose(0, 2, 1, 3)
                     .reshape(n_pad, num_output))
    return out[:n]


def init_params(key, num_hidden, num_features, num_output):
    """Deterministic xavier_normal_ weights + zero biases (matches shapes)."""
    k1, k2, k3 = jax.random.split(key, 3)

    def xavier_normal(k, shape):
        fan_out, fan_in = shape
        std = (2.0 / (fan_in + fan_out)) ** 0.5
        return std * jax.random.normal(k, shape, dtype=jnp.float32)

    w1 = xavier_normal(k1, (num_hidden, num_features))
    b1 = jnp.zeros((num_hidden,), jnp.float32)
    w2 = xavier_normal(k2, (num_hidden, num_hidden))
    b2 = jnp.zeros((num_hidden,), jnp.float32)
    w3 = xavier_normal(k3, (num_output, num_hidden))
    b3 = jnp.zeros((num_output,), jnp.float32)
    return (w1, b1, w2, b2, w3, b3)


def net_forward_ref(x, y, params):
    """Pure-JAX reference for correctness checking."""
    w1, b1, w2, b2, w3, b3 = params
    h = jnp.stack((x, y), axis=1)
    h = jnp.tanh(h @ w1.T + b1)
    for _ in range(5):
        h = jnp.tanh(h @ w2.T + b2)
    return h @ w3.T + b3


if __name__ == "__main__":
    # TODO(synk): nn.Dropout / nn.BatchNorm1d are created in __init__ but never
    # used in forward(), so they are intentionally not implemented.
    num_hidden = 32
    num_features = 2
    num_output = 1
    n = 256  # batch of collocation points (not required to divide the tile)

    key = jax.random.PRNGKey(0)
    kx, ky, kp = jax.random.split(key, 3)
    x = jax.random.uniform(kx, (n,), dtype=jnp.float32)
    y = jax.random.uniform(ky, (n,), dtype=jnp.float32)
    params = init_params(kp, num_hidden, num_features, num_output)

    out = net_forward(x, y, params)          # default picker -> grid=(2,)
    out = jax.block_until_ready(out)

    ref = net_forward_ref(x, y, params)
    assert out.shape == (n, num_output)
    assert jnp.allclose(out, ref, atol=1e-4, rtol=1e-4)

    print("KERNEL_OK")
</pallas_src>

<mosaic_0001>
module attributes {stable_mosaic.version = 11 : i64} {
  func.func @_mlp_kernel(%arg0: i32, %arg1: memref<32x8xf32, #tpu.memory_space<vmem>>, %arg2: memref<8x128xf32, #tpu.memory_space<vmem>>, %arg3: memref<1x128xf32, #tpu.memory_space<vmem>>, %arg4: memref<128x128xf32, #tpu.memory_space<vmem>>, %arg5: memref<1x128xf32, #tpu.memory_space<vmem>>, %arg6: memref<128x4xf32, #tpu.memory_space<vmem>>, %arg7: memref<1x4xf32, #tpu.memory_space<vmem>>, %arg8: memref<32x4xf32, #tpu.memory_space<vmem>>) attributes {dimension_semantics = [#tpu.dimension_semantics<parallel>], iteration_bounds = array<i64: 2>, scalar_prefetch = 0 : i64, scratch_operands = 0 : i64, tpu.core_type = #tpu.core_type<tc>, window_params = [{transform_indices = @transform_0, window_bounds = array<i64: 32, 8>}, {pipeline_mode = #tpu.pipeline_mode<synchronous>, transform_indices = @transform_1, window_bounds = array<i64: 8, 128>}, {pipeline_mode = #tpu.pipeline_mode<synchronous>, transform_indices = @transform_2, window_bounds = array<i64: 1, 128>}, {pipeline_mode = #tpu.pipeline_mode<synchronous>, transform_indices = @transform_3, window_bounds = array<i64: 128, 128>}, {pipeline_mode = #tpu.pipeline_mode<synchronous>, transform_indices = @transform_4, window_bounds = array<i64: 1, 128>}, {pipeline_mode = #tpu.pipeline_mode<synchronous>, transform_indices = @transform_5, window_bounds = array<i64: 128, 4>}, {pipeline_mode = #tpu.pipeline_mode<synchronous>, transform_indices = @transform_6, window_bounds = array<i64: 1, 4>}, {transform_indices = @transform_7, window_bounds = array<i64: 32, 4>}]} {
    %c0 = arith.constant 0 : index
    %c0_0 = arith.constant 0 : index
    %0 = vector.load %arg1[%c0, %c0_0] : memref<32x8xf32, #tpu.memory_space<vmem>>, vector<32x8xf32>
    %c0_1 = arith.constant 0 : index
    %c0_2 = arith.constant 0 : index
    %1 = vector.load %arg2[%c0_1, %c0_2] : memref<8x128xf32, #tpu.memory_space<vmem>>, vector<8x128xf32>
    %cst = arith.constant dense<0.000000e+00> : vector<32x128xf32>
    %2 = tpu.matmul %0, %1, %cst {dimension_numbers = #tpu.dot_dimension_numbers<[1], [0], [0], [1], [0, 0, 1, 1], [], []>} : vector<32x8xf32>, vector<8x128xf32>, vector<32x128xf32> -> vector<32x128xf32>
    %c0_3 = arith.constant 0 : index
    %c0_4 = arith.constant 0 : index
    %3 = vector.load %arg3[%c0_3, %c0_4] : memref<1x128xf32, #tpu.memory_space<vmem>>, vector<1x128xf32>
    %4 = vector.broadcast %3 : vector<1x128xf32> to vector<32x128xf32>
    %5 = arith.addf %2, %4 : vector<32x128xf32>
    %6 = math.tanh %5 : vector<32x128xf32>
    %c0_5 = arith.constant 0 : index
    %c0_6 = arith.constant 0 : index
    %7 = vector.load %arg4[%c0_5, %c0_6] : memref<128x128xf32, #tpu.memory_space<vmem>>, vector<128x128xf32>
    %c0_7 = arith.constant 0 : index
    %c0_8 = arith.constant 0 : index
    %8 = vector.load %arg5[%c0_7, %c0_8] : memref<1x128xf32, #tpu.memory_space<vmem>>, vector<1x128xf32>
    %cst_9 = arith.constant dense<0.000000e+00> : vector<32x128xf32>
    %9 = tpu.matmul %6, %7, %cst_9 {dimension_numbers = #tpu.dot_dimension_numbers<[1], [0], [0], [1], [0, 0, 1, 1], [], []>} : vector<32x128xf32>, vector<128x128xf32>, vector<32x128xf32> -> vector<32x128xf32>
    %10 = vector.broadcast %8 : vector<1x128xf32> to vector<32x128xf32>
    %11 = arith.addf %9, %10 : vector<32x128xf32>
    %12 = math.tanh %11 : vector<32x128xf32>
    %cst_10 = arith.constant dense<0.000000e+00> : vector<32x128xf32>
    %13 = tpu.matmul %12, %7, %cst_10 {dimension_numbers = #tpu.dot_dimension_numbers<[1], [0], [0], [1], [0, 0, 1, 1], [], []>} : vector<32x128xf32>, vector<128x128xf32>, vector<32x128xf32> -> vector<32x128xf32>
    %14 = vector.broadcast %8 : vector<1x128xf32> to vector<32x128xf32>
    %15 = arith.addf %13, %14 : vector<32x128xf32>
    %16 = math.tanh %15 : vector<32x128xf32>
    %cst_11 = arith.constant dense<0.000000e+00> : vector<32x128xf32>
    %17 = tpu.matmul %16, %7, %cst_11 {dimension_numbers = #tpu.dot_dimension_numbers<[1], [0], [0], [1], [0, 0, 1, 1], [], []>} : vector<32x128xf32>, vector<128x128xf32>, vector<32x128xf32> -> vector<32x128xf32>
    %18 = vector.broadcast %8 : vector<1x128xf32> to vector<32x128xf32>
    %19 = arith.addf %17, %18 : vector<32x128xf32>
    %20 = math.tanh %19 : vector<32x128xf32>
    %cst_12 = arith.constant dense<0.000000e+00> : vector<32x128xf32>
    %21 = tpu.matmul %20, %7, %cst_12 {dimension_numbers = #tpu.dot_dimension_numbers<[1], [0], [0], [1], [0, 0, 1, 1], [], []>} : vector<32x128xf32>, vector<128x128xf32>, vector<32x128xf32> -> vector<32x128xf32>
    %22 = vector.broadcast %8 : vector<1x128xf32> to vector<32x128xf32>
    %23 = arith.addf %21, %22 : vector<32x128xf32>
    %24 = math.tanh %23 : vector<32x128xf32>
    %cst_13 = arith.constant dense<0.000000e+00> : vector<32x128xf32>
    %25 = tpu.matmul %24, %7, %cst_13 {dimension_numbers = #tpu.dot_dimension_numbers<[1], [0], [0], [1], [0, 0, 1, 1], [], []>} : vector<32x128xf32>, vector<128x128xf32>, vector<32x128xf32> -> vector<32x128xf32>
    %26 = vector.broadcast %8 : vector<1x128xf32> to vector<32x128xf32>
    %27 = arith.addf %25, %26 : vector<32x128xf32>
    %28 = math.tanh %27 : vector<32x128xf32>
    %c0_14 = arith.constant 0 : index
    %c0_15 = arith.constant 0 : index
    %29 = vector.load %arg6[%c0_14, %c0_15] : memref<128x4xf32, #tpu.memory_space<vmem>>, vector<128x4xf32>
    %cst_16 = arith.constant dense<0.000000e+00> : vector<32x4xf32>
    %30 = tpu.matmul %28, %29, %cst_16 {dimension_numbers = #tpu.dot_dimension_numbers<[1], [0], [0], [1], [0, 0, 1, 1], [], []>} : vector<32x128xf32>, vector<128x4xf32>, vector<32x4xf32> -> vector<32x4xf32>
    %c0_17 = arith.constant 0 : index
    %c0_18 = arith.constant 0 : index
    %31 = vector.load %arg7[%c0_17, %c0_18] : memref<1x4xf32, #tpu.memory_space<vmem>>, vector<1x4xf32>
    %32 = vector.broadcast %31 : vector<1x4xf32> to vector<32x4xf32>
    %33 = arith.addf %30, %32 : vector<32x4xf32>
    %c0_19 = arith.constant 0 : index
    %c0_20 = arith.constant 0 : index
    %34 = vector.load %arg8[%c0_19, %c0_20] : memref<32x4xf32, #tpu.memory_space<vmem>>, vector<32x4xf32>
    tpu.vector_store %arg8[%c0_19, %c0_20], %33 {strides = array<i32>} : memref<32x4xf32, #tpu.memory_space<vmem>>, vector<32x4xf32>,
    return
  }
  func.func @transform_0(%arg0: i32) -> (i32, i32) {
    %c0_i32 = arith.constant 0 : i32
    %c0_i32_0 = arith.constant 0 : i32
    return %arg0, %c0_i32 : i32, i32
  }
  func.func @transform_1(%arg0: i32) -> (i32, i32) {
    %c0_i32 = arith.constant 0 : i32
    %c0_i32_0 = arith.constant 0 : i32
    %c0_i32_1 = arith.constant 0 : i32
    return %c0_i32, %c0_i32_0 : i32, i32
  }
  func.func @transform_2(%arg0: i32) -> (i32, i32) {
    %c0_i32 = arith.constant 0 : i32
    %c0_i32_0 = arith.constant 0 : i32
    %c0_i32_1 = arith.constant 0 : i32
    return %c0_i32, %c0_i32_0 : i32, i32
  }
  func.func @transform_3(%arg0: i32) -> (i32, i32) {
    %c0_i32 = arith.constant 0 : i32
    %c0_i32_0 = arith.constant 0 : i32
    %c0_i32_1 = arith.constant 0 : i32
    return %c0_i32, %c0_i32_0 : i32, i32
  }
  func.func @transform_4(%arg0: i32) -> (i32, i32) {
    %c0_i32 = arith.constant 0 : i32
    %c0_i32_0 = arith.constant 0 : i32
    %c0_i32_1 = arith.constant 0 : i32
    return %c0_i32, %c0_i32_0 : i32, i32
  }
  func.func @transform_5(%arg0: i32) -> (i32, i32) {
    %c0_i32 = arith.constant 0 : i32
    %c0_i32_0 = arith.constant 0 : i32
    %c0_i32_1 = arith.constant 0 : i32
    return %c0_i32, %c0_i32_0 : i32, i32
  }
  func.func @transform_6(%arg0: i32) -> (i32, i32) {
    %c0_i32 = arith.constant 0 : i32
    %c0_i32_0 = arith.constant 0 : i32
    %c0_i32_1 = arith.constant 0 : i32
    return %c0_i32, %c0_i32_0 : i32, i32
  }
  func.func @transform_7(%arg0: i32) -> (i32, i32) {
    %c0_i32 = arith.constant 0 : i32
    %c0_i32_0 = arith.constant 0 : i32
    return %arg0, %c0_i32 : i32, i32
  }
}

</mosaic_0001>

<bundles_post_ra>
// kernel: tpu_custom_call.1
= control target key start
LH: loop header
LB: loop body
LE: loop exit
PB: predicated region body
PF: predicated region fallthrough
CT: control target
= control target key end

     0   :  { %s786_s24 = smov 0   ;;  %s1038_s0 = inlined_call_operand.vmem [shape: f32[64,8], index: 0, kind: input, shape index: {}]   ;;  %s1039_s1 = inlined_call_operand.vmem [shape: f32[8,128], index: 1, kind: input, shape index: {}]   ;;  %s1040_s2 = inlined_call_operand.vmem [shape: f32[1,128], index: 2, kind: input, shape index: {}]   ;;  %s1041_s3 = inlined_call_operand.vmem [shape: f32[128,128], index: 3, kind: input, shape index: {}]   ;;  %s1042_s4 = inlined_call_operand.vmem [shape: f32[1,128], index: 4, kind: input, shape index: {}]   ;;  %s1043_s5 = inlined_call_operand.vmem [shape: f32[128,4], index: 5, kind: input, shape index: {}]   ;;  %s1044_s6 = inlined_call_operand.vmem [shape: f32[1,4], index: 6, kind: input, shape index: {}]   ;;  %s1045_s7 = inlined_call_operand.vmem [shape: f32[64,4], index: 7, kind: output, shape index: {}]  }
   0x1 LB: > { %s632_s25 = sadd.s32 4294967295, %s744_s24   ;;  %p636_p0 = scmp.ge.s32.totalorder %s744_s24, 1  ;;  %s744_s24 = sphi %s786_s24, %s17_s24  }
   0x2   : > { %p238_p1 = scmp.lt.s32.totalorder %s744_s24, 3 }
   0x4   : > { %p239_p2 = pnand %p636_p0, %p238_p1 }
   0x5   : > { %s637_s28 = sshll.u32 (!%p239_p2), %s632_s25, 2 }
   0x6   : > { %242 = sbr.rel (%p239_p2) target bundleno = 1006 (0x3ee), region = 48  ;;  %p271_p3 = scmp.lt.s32.totalorder (!%p239_p2), %s637_s28, 7 }
   0xb   : > { %v286_v0 = vld [vmem:[%s1039_s1] sm:$0xff]  ;;  %v800_v1 = vld [vmem:[%s1041_s3 + $0x78] sm:$0xff]  ;;  %v805_v2 = vld [vmem:[%s1041_s3 + $0x70] sm:$0xff]  ;;  %s1047_s28 = smov (!%p271_p3, %s637_s28), 7  ;;  %vm291_vm0 = vcmask 64512   ;;  %vm571_vm1 = vcmask 31744  }
   0xc   : > { %319 = vmatpush.msra.mxu0 %v286_v0  ;;  %357 = vmatpush.msra.mxu1 %v800_v1  ;;  %v811_v3 = vld [vmem:[%s1041_s3 + $0x68] sm:$0xff]  ;;  %v822_v4 = vld [vmem:[%s1041_s3 + $0x60] sm:$0xff]  ;;  %s638_s14 = sshll.u32 %s1047_s28, 3  ;;  %v839_v5 = vld [vmem:[%s1041_s3 + $0x58] sm:$0xff] }
   0xd   : > { %390 = vmatpush.msra.mxu2 %v800_v1  ;;  %423 = vmatpush.msra.mxu3 %v800_v1  ;;  %s834_s17 = scalar_lea.vmem %s1038_s0, %s638_s14  ;;  %v850_v7 = vld [vmem:[%s1041_s3 + $0x50] sm:$0xff]  ;;  %v858_v8 = vld [vmem:[%s1041_s3 + $0x48] sm:$0xff]  ;;  %v867_v9 = vld [vmem:[%s1041_s3 + $0x40] sm:$0xff]  ;;  %s280_s22 = scalar_lea.vmem %s1045_s7, %s638_s14 }
   0xe   : > { %358 = vmatpush.msra.mxu1 %v805_v2  ;;  %456 = vmatpush.msrb.mxu0 %v800_v1  ;;  %v282_v6 = vld [vmem:[%s834_s17] sm:$0xff]  ;;  %v283_v10 = vld [vmem:[%s834_s17 + $0x8] sm:$0xff]  ;;  %v877_v11 = vld [vmem:[%s1041_s3 + $0x38] sm:$0xff] }
   0xf   : > { %391 = vmatpush.msra.mxu2 %v805_v2  ;;  %424 = vmatpush.msra.mxu3 %v805_v2  ;;  %v887_v12 = vld [vmem:[%s1041_s3 + $0x30] sm:$0xff]  ;;  %v895_v13 = vld [vmem:[%s1041_s3 + $0x28] sm:$0xff]  ;;  %v285_v15 = vld [vmem:[%s834_s17 + $0x18] sm:$0xff] }
  0x10   : > { %359 = vmatpush.msra.mxu1 %v811_v3  ;;  %457 = vmatpush.msrb.mxu0 %v805_v2  ;;  %v284_v14 = vld [vmem:[%s834_s17 + $0x10] sm:$0xff]  ;;  %v341_v16 = vld [vmem:[%s1041_s3 + $0x20] sm:$0xff]  ;;  %v340_v17 = vld [vmem:[%s1041_s3 + $0x18] sm:$0xff] }
  0x11   : > { %392 = vmatpush.msra.mxu2 %v811_v3  ;;  %425 = vmatpush.msra.mxu3 %v811_v3  ;;  %v339_v18 = vld [vmem:[%s1041_s3 + $0x10] sm:$0xff]  ;;  %v338_v19 = vld [vmem:[%s1041_s3 + $0x8] sm:$0xff]  ;;  %v337_v20 = vld [vmem:[%s1041_s3] sm:$0xff] }
  0x12   : > { %360 = vmatpush.msra.mxu1 %v822_v4  ;;  %458 = vmatpush.msrb.mxu0 %v811_v3  ;;  %v687_v21 = vld [vmem:[%s1040_s2] ss:$0 sm:$0xff] }
  0x13   : > { %641 = vmatmul.msk.f32.vlgmr.msra.gmra.mxu0 %vm291_vm0, %v282_v6  ;;  %393 = vmatpush.msra.mxu2 %v822_v4  ;;  %v957_v34 = vld [vmem:[%s1042_s4] ss:$0 sm:$0xff] }
  0x14   : > { %361 = vmatpush.msra.mxu1 %v839_v5  ;;  %426 = vmatpush.msra.mxu3 %v822_v4 }
  0x15   : > { %394 = vmatpush.msra.mxu2 %v839_v5  ;;  %459 = vmatpush.msrb.mxu0 %v822_v4 }
  0x16   : > { %362 = vmatpush.msra.mxu1 %v850_v7  ;;  %427 = vmatpush.msra.mxu3 %v839_v5 }
  0x17   : > { %395 = vmatpush.msra.mxu2 %v850_v7  ;;  %460 = vmatpush.msrb.mxu0 %v839_v5 }
  0x18   : > { %363 = vmatpush.msra.mxu1 %v858_v8  ;;  %428 = vmatpush.msra.mxu3 %v850_v7 }
  0x19   : > { %396 = vmatpush.msra.mxu2 %v858_v8  ;;  %461 = vmatpush.msrb.mxu0 %v850_v7 }
  0x1a   : > { %364 = vmatpush.msra.mxu1 %v867_v9  ;;  %429 = vmatpush.msra.mxu3 %v858_v8 }
  0x1b   : > { %642 = vmatmul.msk.f32.gmra.mxu0 %vm291_vm0, %v283_v10  ;;  %397 = vmatpush.msra.mxu2 %v867_v9  ;;  %v536_v10 = vld [vmem:[%s1043_s5 + $0x70] sm:$0xff] }
  0x1c   : > { %365 = vmatpush.msra.mxu1 %v877_v11  ;;  %430 = vmatpush.msra.mxu3 %v867_v9 }
  0x1d   : > { %398 = vmatpush.msra.mxu2 %v877_v11  ;;  %462 = vmatpush.msrb.mxu0 %v858_v8 }
  0x1e   : > { %366 = vmatpush.msra.mxu1 %v887_v12  ;;  %431 = vmatpush.msra.mxu3 %v877_v11 }
  0x1f   : > { %399 = vmatpush.msra.mxu2 %v887_v12  ;;  %463 = vmatpush.msrb.mxu0 %v867_v9 }
  0x20   : > { %367 = vmatpush.msra.mxu1 %v895_v13  ;;  %432 = vmatpush.msra.mxu3 %v887_v12 }
  0x21   : > { %400 = vmatpush.msra.mxu2 %v895_v13  ;;  %464 = vmatpush.msrb.mxu0 %v877_v11 }
  0x22   : > { %433 = vmatpush.msra.mxu3 %v895_v13  ;;  %368 = vmatpush.msra.mxu1 %v341_v16 }
  0x23   : > { %643 = vmatmul.msk.f32.gmra.mxu0 %vm291_vm0, %v284_v14  ;;  %401 = vmatpush.msra.mxu2 %v341_v16  ;;  %v533_v14 = vld [vmem:[%s1043_s5 + $0x58] sm:$0xff] }
  0x24   : > { %465 = vmatpush.msrb.mxu0 %v887_v12  ;;  %434 = vmatpush.msra.mxu3 %v341_v16 }
  0x25   : > { %369 = vmatpush.msra.mxu1 %v340_v17  ;;  %402 = vmatpush.msra.mxu2 %v340_v17 }
  0x26   : > { %466 = vmatpush.msrb.mxu0 %v895_v13  ;;  %435 = vmatpush.msra.mxu3 %v340_v17 }
  0x27   : > { %370 = vmatpush.msra.mxu1 %v339_v18  ;;  %403 = vmatpush.msra.mxu2 %v339_v18 }
  0x28   : > { %467 = vmatpush.msrb.mxu0 %v341_v16  ;;  %436 = vmatpush.msra.mxu3 %v339_v18 }
  0x29   : > { %371 = vmatpush.msra.mxu1 %v338_v19  ;;  %404 = vmatpush.msra.mxu2 %v338_v19 }
  0x2a   : > { %468 = vmatpush.msrb.mxu0 %v340_v17  ;;  %437 = vmatpush.msra.mxu3 %v338_v19 }
  0x2b   : > { %644 = vmatmul.msk.f32.gmra.mxu0 %vm291_vm0, %v285_v15  ;;  %372 = vmatpush.msra.mxu1 %v337_v20 }
  0x2c   : > { %469 = vmatpush.msrb.mxu0 %v339_v18  ;;  %405 = vmatpush.msra.mxu2 %v337_v20 }
  0x2d   : > { %438 = vmatpush.msra.mxu3 %v337_v20  ;;  %489 = vmatpush.msrb.mxu1 %v800_v1 }
  0x2e   : > { %470 = vmatpush.msrb.mxu0 %v338_v19 }
  0x2f   : > { %647 = vmatpush.msrb.mxu3 %v800_v1  ;;  %490 = vmatpush.msrb.mxu1 %v805_v2 }
  0x30   : > { %471 = vmatpush.msrb.mxu0 %v337_v20 }
  0x31   : > { %648 = vmatpush.msrb.mxu3 %v805_v2  ;;  %491 = vmatpush.msrb.mxu1 %v811_v3 }
  0x33   : > { %649 = vmatpush.msrb.mxu3 %v811_v3  ;;  %492 = vmatpush.msrb.mxu1 %v822_v4 }
  0x35   : > { %650 = vmatpush.msrb.mxu3 %v822_v4  ;;  %493 = vmatpush.msrb.mxu1 %v839_v5 }
  0x37   : > { %651 = vmatpush.msrb.mxu3 %v839_v5  ;;  %494 = vmatpush.msrb.mxu1 %v850_v7 }
  0x39   : > { %652 = vmatpush.msrb.mxu3 %v850_v7  ;;  %495 = vmatpush.msrb.mxu1 %v858_v8 }
  0x3b   : > { %653 = vmatpush.msrb.mxu3 %v858_v8  ;;  %496 = vmatpush.msrb.mxu1 %v867_v9 }
  0x3d   : > { %654 = vmatpush.msrb.mxu3 %v867_v9  ;;  %497 = vmatpush.msrb.mxu1 %v877_v11  ;;  %v537_v9 = vld [vmem:[%s1043_s5 + $0x78] sm:$0xff] }
  0x3e   : > { %542 = vmatpush.msra.mxu0 %v537_v9  ;;  %663 = vmatpush.msrb.mxu2 %v537_v9 }
  0x3f   : > { %655 = vmatpush.msrb.mxu3 %v877_v11  ;;  %498 = vmatpush.msrb.mxu1 %v887_v12  ;;  %v535_v11 = vld [vmem:[%s1043_s5 + $0x68] sm:$0xff] }
  0x40   : > { %543 = vmatpush.msra.mxu0 %v536_v10  ;;  %664 = vmatpush.msrb.mxu2 %v536_v10 }
  0x41   : > { %656 = vmatpush.msrb.mxu3 %v887_v12  ;;  %499 = vmatpush.msrb.mxu1 %v895_v13  ;;  %v534_v12 = vld [vmem:[%s1043_s5 + $0x60] sm:$0xff] }
  0x42   : > { %544 = vmatpush.msra.mxu0 %v535_v11  ;;  %665 = vmatpush.msrb.mxu2 %v535_v11 }
  0x43   : > { %657 = vmatpush.msrb.mxu3 %v895_v13  ;;  %500 = vmatpush.msrb.mxu1 %v341_v16 }
  0x44   : > { %545 = vmatpush.msra.mxu0 %v534_v12  ;;  %666 = vmatpush.msrb.mxu2 %v534_v12 }
  0x45   : > { %658 = vmatpush.msrb.mxu3 %v341_v16  ;;  %501 = vmatpush.msrb.mxu1 %v340_v17 }
  0x46   : > { %546 = vmatpush.msra.mxu0 %v533_v14  ;;  %667 = vmatpush.msrb.mxu2 %v533_v14 }
  0x47   : > { %659 = vmatpush.msrb.mxu3 %v340_v17  ;;  %502 = vmatpush.msrb.mxu1 %v339_v18  ;;  %v532_v17 = vld [vmem:[%s1043_s5 + $0x50] sm:$0xff] }
  0x48   : > { %547 = vmatpush.msra.mxu0 %v532_v17  ;;  %668 = vmatpush.msrb.mxu2 %v532_v17 }
  0x49   : > { %660 = vmatpush.msrb.mxu3 %v339_v18  ;;  %503 = vmatpush.msrb.mxu1 %v338_v19  ;;  %v531_v18 = vld [vmem:[%s1043_s5 + $0x48] sm:$0xff] }
  0x4a   : > { %548 = vmatpush.msra.mxu0 %v531_v18  ;;  %669 = vmatpush.msrb.mxu2 %v531_v18 }
  0x4b   : > { %661 = vmatpush.msrb.mxu3 %v338_v19  ;;  %504 = vmatpush.msrb.mxu1 %v337_v20  ;;  %v530_v19 = vld [vmem:[%s1043_s5 + $0x40] sm:$0xff] }
  0x4c   : > { %549 = vmatpush.msra.mxu0 %v530_v19  ;;  %670 = vmatpush.msrb.mxu2 %v530_v19 }
  0x4d   : > { %662 = vmatpush.msrb.mxu3 %v337_v20 }
  0x90   : > { %v321_v22 = vpop.f32.mrf.mxu0 }
  0x91   : > { %v322_v23 = vadd.f32 %v687_v21, %v321_v22 }
  0x93   : > { %690 = vtanh.f32 %v322_v23 }
  0x98   : > { %v324_v24 = vpop.f32.mrf.mxu0 }
  0x99   : > { %v691_v25 = vpop.eup %690  ;;  %v325_v26 = vadd.f32 %v687_v21, %v324_v24  ;;  %v528_v24 = vld [vmem:[%s1043_s5 + $0x30] sm:$0xff] }
  0x9a   : > { %373 = vmatmul.f32.vlgmr.msra.gmra.mxu1 %v691_v25  ;;  %v527_v25 = vld [vmem:[%s1043_s5 + $0x28] sm:$0xff] }
  0x9b   : > { %692 = vtanh.f32 %v325_v26 }
  0xa0   : > { %v327_v27 = vpop.f32.mrf.mxu0 }
  0xa1   : > { %v693_v28 = vpop.eup %692  ;;  %v328_v29 = vadd.f32 %v687_v21, %v327_v27 }
  0xa2   : > { %376 = vmatmul.f32.gmra.mxu1 %v693_v28 }
  0xa3   : > { %694 = vtanh.f32 %v328_v29 }
  0xa8   : > { %v330_v30 = vpop.f32.mrf.mxu0 }
  0xa9   : > { %v695_v31 = vpop.eup %694  ;;  %v331_v32 = vadd.f32 %v687_v21, %v330_v30  ;;  %v529_v21 = vld [vmem:[%s1043_s5 + $0x38] sm:$0xff]  ;;  %v526_v30 = vld [vmem:[%s1043_s5 + $0x20] sm:$0xff] }
  0xaa   : > { %379 = vmatmul.f32.gmra.mxu1 %v695_v31  ;;  %550 = vmatpush.msra.mxu0 %v529_v21  ;;  %v525_v31 = vld [vmem:[%s1043_s5 + $0x18] sm:$0xff] }
  0xab   : > { %696 = vtanh.f32 %v331_v32  ;;  %671 = vmatpush.msrb.mxu2 %v529_v21  ;;  %v524_v32 = vld [vmem:[%s1043_s5 + $0x10] sm:$0xff] }
  0xac   : > { %551 = vmatpush.msra.mxu0 %v528_v24 }
  0xad   : > { %672 = vmatpush.msrb.mxu2 %v528_v24 }
  0xae   : > { %552 = vmatpush.msra.mxu0 %v527_v25 }
  0xaf   : > { %673 = vmatpush.msrb.mxu2 %v527_v25 }
  0xb0   : > { %553 = vmatpush.msra.mxu0 %v526_v30 }
  0xb1   : > { %v697_v33 = vpop.eup %696  ;;  %674 = vmatpush.msrb.mxu2 %v526_v30 }
  0xb2   : > { %382 = vmatmul.f32.gmra.mxu1 %v697_v33  ;;  %554 = vmatpush.msra.mxu0 %v525_v31  ;;  %v523_v33 = vld [vmem:[%s1043_s5 + $0x8] sm:$0xff] }
  0xb3   : > { %675 = vmatpush.msrb.mxu2 %v525_v31 }
  0xb4   : > { %555 = vmatpush.msra.mxu0 %v524_v32 }
  0xb5   : > { %676 = vmatpush.msrb.mxu2 %v524_v32 }
  0xb6   : > { %556 = vmatpush.msra.mxu0 %v523_v33 }
  0xb7   : > { %677 = vmatpush.msrb.mxu2 %v523_v33 }
 0x117   : > { %v374_v35 = vpop.f32.mrf.mxu1 }
 0x118   : > { %v375_v36 = vadd.f32 %v957_v34, %v374_v35  ;;  %v522_v35 = vld [vmem:[%s1043_s5] sm:$0xff] }
 0x119   : > { %557 = vmatpush.msra.mxu0 %v522_v35  ;;  %678 = vmatpush.msrb.mxu2 %v522_v35 }
 0x11a   : > { %698 = vtanh.f32 %v375_v36 }
 0x11f   : > { %v377_v37 = vpop.f32.mrf.mxu1 }
 0x120   : > { %v699_v38 = vpop.eup %698  ;;  %v378_v39 = vadd.f32 %v957_v34, %v377_v37 }
 0x121   : > { %406 = vmatmul.f32.vlgmr.msra.gmra.mxu2 %v699_v38 }
 0x122   : > { %700 = vtanh.f32 %v378_v39 }
 0x127   : > { %v380_v40 = vpop.f32.mrf.mxu1 }
 0x128   : > { %v701_v41 = vpop.eup %700  ;;  %v381_v42 = vadd.f32 %v957_v34, %v380_v40 }
 0x129   : > { %409 = vmatmul.f32.gmra.mxu2 %v701_v41 }
 0x12a   : > { %702 = vtanh.f32 %v381_v42 }
 0x12f   : > { %v383_v43 = vpop.f32.mrf.mxu1 }
 0x130   : > { %v703_v44 = vpop.eup %702  ;;  %v384_v45 = vadd.f32 %v957_v34, %v383_v43 }
 0x131   : > { %412 = vmatmul.f32.gmra.mxu2 %v703_v44 }
 0x132   : > { %704 = vtanh.f32 %v384_v45 }
 0x138   : > { %v705_v46 = vpop.eup %704 }
 0x139   : > { %415 = vmatmul.f32.gmra.mxu2 %v705_v46 }
 0x1a4   : > { %v407_v47 = vpop.f32.mrf.mxu2 }
 0x1a5   : > { %v408_v48 = vadd.f32 %v957_v34, %v407_v47 }
 0x1a7   : > { %706 = vtanh.f32 %v408_v48  ;;  %v689_v48 = vld [vmem:[%s1044_s6] ss:$0 sm:$0xff] }
 0x1ac   : > { %v410_v49 = vpop.f32.mrf.mxu2 }
 0x1ad   : > { %v707_v50 = vpop.eup %706  ;;  %v411_v51 = vadd.f32 %v957_v34, %v410_v49 }
 0x1ae   : > { %439 = vmatmul.f32.vlgmr.msra.gmra.mxu3 %v707_v50 }
 0x1af   : > { %708 = vtanh.f32 %v411_v51 }
 0x1b4   : > { %v413_v52 = vpop.f32.mrf.mxu2 }
 0x1b5   : > { %v709_v53 = vpop.eup %708  ;;  %v414_v54 = vadd.f32 %v957_v34, %v413_v52 }
 0x1b6   : > { %442 = vmatmul.f32.gmra.mxu3 %v709_v53 }
 0x1b7   : > { %710 = vtanh.f32 %v414_v54 }
 0x1bc   : > { %v416_v55 = vpop.f32.mrf.mxu2 }
 0x1bd   : > { %v711_v56 = vpop.eup %710  ;;  %v417_v57 = vadd.f32 %v957_v34, %v416_v55 }
 0x1be   : > { %445 = vmatmul.f32.gmra.mxu3 %v711_v56 }
 0x1bf   : > { %712 = vtanh.f32 %v417_v57 }
 0x1c5   : > { %v713_v58 = vpop.eup %712 }
 0x1c6   : > { %448 = vmatmul.f32.gmra.mxu3 %v713_v58 }
 0x231   : > { %v440_v59 = vpop.f32.mrf.mxu3 }
 0x232   : > { %v441_v60 = vadd.f32 %v957_v34, %v440_v59 }
 0x234   : > { %714 = vtanh.f32 %v441_v60 }
 0x239   : > { %v443_v61 = vpop.f32.mrf.mxu3 }
 0x23a   : > { %v715_v62 = vpop.eup %714  ;;  %v444_v63 = vadd.f32 %v957_v34, %v443_v61 }
 0x23b   : > { %472 = vmatmul.f32.vlgmr.msrb.gmra.mxu0 %v715_v62 }
 0x23c   : > { %716 = vtanh.f32 %v444_v63 }
 0x241   : > { %v446_v0 = vpop.f32.mrf.mxu3 }
 0x242   : > { %v717_v1 = vpop.eup %716  ;;  %v447_v2 = vadd.f32 %v957_v34, %v446_v0 }
 0x243   : > { %475 = vmatmul.f32.gmra.mxu0 %v717_v1 }
 0x244   : > { %718 = vtanh.f32 %v447_v2 }
 0x249   : > { %v449_v3 = vpop.f32.mrf.mxu3 }
 0x24a   : > { %v719_v4 = vpop.eup %718  ;;  %v450_v5 = vadd.f32 %v957_v34, %v449_v3 }
 0x24b   : > { %478 = vmatmul.f32.gmra.mxu0 %v719_v4 }
 0x24c   : > { %720 = vtanh.f32 %v450_v5 }
 0x252   : > { %v721_v6 = vpop.eup %720 }
 0x253   : > { %481 = vmatmul.f32.gmra.mxu0 %v721_v6 }
 0x2b8   : > { %v473_v7 = vpop.f32.mrf.mxu0 }
 0x2b9   : > { %v474_v8 = vadd.f32 %v957_v34, %v473_v7 }
 0x2bb   : > { %722 = vtanh.f32 %v474_v8 }
 0x2c0   : > { %v476_v13 = vpop.f32.mrf.mxu0 }
 0x2c1   : > { %v723_v15 = vpop.eup %722  ;;  %v477_v16 = vadd.f32 %v957_v34, %v476_v13 }
 0x2c2   : > { %505 = vmatmul.f32.vlgmr.msrb.gmra.mxu1 %v723_v15 }
 0x2c3   : > { %724 = vtanh.f32 %v477_v16 }
 0x2c8   : > { %v479_v20 = vpop.f32.mrf.mxu0 }
 0x2c9   : > { %v725_v22 = vpop.eup %724  ;;  %v480_v23 = vadd.f32 %v957_v34, %v479_v20 }
 0x2ca   : > { %508 = vmatmul.f32.gmra.mxu1 %v725_v22 }
 0x2cb   : > { %726 = vtanh.f32 %v480_v23 }
 0x2d0   : > { %v482_v26 = vpop.f32.mrf.mxu0 }
 0x2d1   : > { %v727_v27 = vpop.eup %726  ;;  %v483_v28 = vadd.f32 %v957_v34, %v482_v26 }
 0x2d2   : > { %511 = vmatmul.f32.vlgmr.msrb.gmra.mxu3 %v727_v27 }
 0x2d3   : > { %728 = vtanh.f32 %v483_v28 }
 0x2d9   : > { %v729_v29 = vpop.eup %728 }
 0x2da   : > { %514 = vmatmul.f32.gmra.mxu3 %v729_v29 }
 0x33f   : > { %v506_v36 = vpop.f32.mrf.mxu1 }
 0x340   : > { %v507_v37 = vadd.f32 %v957_v34, %v506_v36 }
 0x342   : > { %730 = vtanh.f32 %v507_v37 }
 0x347   : > { %v509_v38 = vpop.f32.mrf.mxu1 }
 0x348   : > { %v731_v39 = vpop.eup %730  ;;  %v510_v40 = vadd.f32 %v957_v34, %v509_v38 }
 0x349   : > { %558 = vmatmul.f32.vlgmr.msra.gmra.mxu0 %v731_v39 }
 0x34a   : > { %732 = vtanh.f32 %v510_v40 }
 0x350   : > { %v733_v41 = vpop.eup %732 }
 0x351   : > { %561 = vmatmul.f32.gmra.mxu0 %v733_v41 }
 0x355   : > { %v512_v42 = vpop.f32.mrf.mxu3 }
 0x356   : > { %v513_v43 = vadd.f32 %v957_v34, %v512_v42 }
 0x358   : > { %734 = vtanh.f32 %v513_v43 }
 0x35d   : > { %v515_v44 = vpop.f32.mrf.mxu3 }
 0x35e   : > { %v735_v45 = vpop.eup %734  ;;  %v516_v46 = vadd.f32 %v957_v34, %v515_v44 }
 0x35f   : > { %564 = vmatmul.f32.vlgmr.msrb.gmra.mxu2 %v735_v45 }
 0x360   : > { %736 = vtanh.f32 %v516_v46 }
 0x366   : > { %v737_v47 = vpop.eup %736 }
 0x367   : > { %567 = vmatmul.f32.gmra.mxu2 %v737_v47 }
 0x3c6   : > { %v559_v49 = vpop.f32.mrf.mxu0 }
 0x3c7   : > { %v560_v50 = vadd.f32 %v689_v48, %v559_v49 }
 0x3c9   : > { %572 = vst.msk [vmem:[%s280_s22] sm:$0xff] %vm571_vm1, %v560_v50 }
 0x3ce   : > { %v562_v51 = vpop.f32.mrf.mxu0 }
 0x3cf   : > { %v563_v52 = vadd.f32 %v689_v48, %v562_v51 }
 0x3d1   : > { %573 = vst.msk [vmem:[%s280_s22 + $0x8] sm:$0xff] %vm571_vm1, %v563_v52 }
 0x3e2   : > { %v565_v34 = vpop.f32.mrf.mxu2 }
 0x3e3   : > { %v566_v53 = vadd.f32 %v689_v48, %v565_v34 }
 0x3e5   : > { %574 = vst.msk [vmem:[%s280_s22 + $0x10] sm:$0xff] %vm571_vm1, %v566_v53 }
 0x3ea   : > { %v568_v54 = vpop.f32.mrf.mxu2 }
 0x3eb   : > { %v569_v55 = vadd.f32 %v689_v48, %v568_v54 }
 0x3ed   : > { %575 = vst.msk [vmem:[%s280_s22 + $0x18] sm:$0xff] %vm571_vm1, %v569_v55 }
 0x3ee PF: > { %s17_s24 = sadd.s32 1, %s744_s24  }
 0x3ef   : > { %p14_p4 = scmp.ge.s32.totalorder %s17_s24, 4  }
 0x3f1   :  { %16 = sbr.rel (!%p14_p4) target bundleno = 1 (0x1), region = 78 }

</bundles_post_ra>
